<compile_context>
chip_gen: v7x
topology: tpu7x:2x2x1
jax: 0.10.0
libtpu: 0.0.40
codegen_flags: <defaults>
</compile_context>

<pallas_src>
import functools

import jax
import jax.numpy as jnp
import numpy as np
from jax.experimental import pallas as pl
from jax.experimental.pallas import tpu as pltpu

PAD = 3          # stencil halo of the largest (7x7) directional kernel
HALO = 8         # rows fetched above/below each strip (sublane-aligned >= PAD)
_LANES = 128
_SUBLANES = 8
_RADII = (1, 2, 3)


def _round_up(a, m):
    return -(-a // m) * m


# --------------------------------- kernel ----------------------------------


def _pam_kernel(xc_ref, xu_ref, xd_ref, o_ref, xbuf_ref, *, H, W, Th, acc_dtype):
    """One (batch block, row strip) grid step.

    xc_ref : (nb, Th, Wb)   image rows [i*Th, i*Th+Th)   (tail clipped)
    xu_ref : (nb, 8,  Wb)   image rows [i*Th-8, i*Th)    (clamped block index)
    xd_ref : (nb, 8,  Wb)   image rows [i*Th+Th, +8)     (clamped block index)
    o_ref  : (nb, Th, Wb)   output strip (OOB rows/cols clipped on store)
    xbuf_ref: VMEM scratch (nb, Th+16, Wb) holding the zero-masked strip+halo.
    """
    i = pl.program_id(1)
    row0 = i * Th                       # global image row of output row 0

    def put(dst_row, piece, piece_row0, check_top):
        # Write `piece` into the assembly buffer, zeroing everything outside
        # the true image: this reproduces F.conv2d's zero padding and also
        # kills the garbage in clipped partial blocks (lane tail >= W, row
        # tail >= H, rows < 0 above the first strip).
        _, rows_n, wb = piece.shape
        rows = jax.lax.broadcasted_iota(jnp.int32, (1, rows_n, wb), 1) + piece_row0
        cols = jax.lax.broadcasted_iota(jnp.int32, (1, rows_n, wb), 2)
        if check_top:
            ok = jnp.logical_and(rows >= 0, cols < W)     # halo above the image
        else:
            ok = jnp.logical_and(rows < H, cols < W)      # body / halo below
        xbuf_ref[:, dst_row:dst_row + rows_n, :] = jnp.where(
            ok, piece.astype(acc_dtype), jnp.zeros((), acc_dtype))

    put(0, xu_ref[...], row0 - HALO, check_top=True)
    put(HALO, xc_ref[...], row0, check_top=False)
    put(HALO + Th, xd_ref[...], row0 + Th, check_top=False)

    x = xbuf_ref[...]                   # (nb, Th + 2*HALO, Wb), zero-masked
    wb = x.shape[-1]

    def row_windows(slab, offsets):
        acc = None
        for di in offsets:
            w = slab[:, HALO + di:HALO + di + Th, :]
            acc = w if acc is None else acc + w
        return acc

    center = x[:, HALO:HALO + Th, :]

    # dj == 0 contributions of every ring (rows +-r of the unshifted slab).
    rings = [row_windows(x, (-r, r)) for r in _RADII]

    # One lane-shifted slab at a time (pltpu.roll -> XLU slot), folded
    # straight into its ring accumulator so only ~one extra block-sized
    # temporary is ever live.  Wb >= W + PAD guarantees the rotated
    # wrap-around columns land in the zero-masked / cropped lane tail, i.e.
    # the roll behaves exactly like a shift-with-zero-fill.  (The ring tap
    # set is symmetric in dj, so the result is independent of the roll
    # direction convention.)
    for dj in (-3, -2, -1, 1, 2, 3):
        slab = pltpu.roll(x, shift=(-dj) % wb, axis=2)
        r = abs(dj)
        rings[r - 1] = rings[r - 1] + row_windows(slab, (-r, 0, r))

    # d_r = 8*x - ring_r   =>   max(d3, d5, d7) = 8*x - min(ring1, ring2, ring3)
    ring_min = jnp.minimum(jnp.minimum(rings[0], rings[1]), rings[2])
    z = jnp.maximum(8.0 * center - ring_min, 0.0)          # relu(max(d3,d5,d7))
    # sigmoid(z) with z >= 0: 1 / (1 + exp(-z)); exp + reciprocal go to the EUP.
    o_ref[...] = pl.reciprocal(1.0 + jnp.exp(-z), approx=True).astype(o_ref.dtype)


# --------------------------------- wrapper ----------------------------------


def _pick_tiling(N, H, W, in_itemsize, acc_itemsize, vmem_cap):
    """Strip height / batch packing under a generation-aware VMEM budget."""
    Wb = _round_up(W + PAD, _LANES)        # lane-dense, with room for the dj wrap
    budget = int(0.40 * vmem_cap)

    def vmem_estimate(nb, th):
        rows = th + 2 * HALO
        # double-buffered input (body + 2 halos) and output blocks
        pipeline = 2 * nb * Wb * ((rows * in_itemsize) + th * in_itemsize)
        # assembly scratch + live temporaries in the dj loop (x, rolled slab,
        # 3 ring accumulators, center, window temp)
        working = 8 * nb * rows * Wb * acc_itemsize
        return pipeline + working

    th = min(_round_up(H, _SUBLANES), 256)
    while th > _SUBLANES and vmem_estimate(1, th) > budget:
        th = max(_SUBLANES, _round_up(th // 2, _SUBLANES))

    # Pack several small images per step to amortize the ~0.35us/step grid
    # overhead, while keeping the per-step input block modest.
    nb = 1
    while (2 * nb <= N
           and vmem_estimate(2 * nb, th) <= budget
           and 2 * nb * (th + 2 * HALO) * Wb * in_itemsize <= (4 << 20)):
        nb *= 2

    # Keep >= 2 grid steps whenever there is more than one image so a v7x can
    # spread the work across both of its TensorCores.
    if pl.cdiv(N, nb) * pl.cdiv(H, th) < 2 and N > 1:
        nb = max(1, nb // 2)

    return th, nb, Wb, vmem_estimate(nb, th)


@jax.jit
def pam_forward(x):
    """x: (N, 1, H, W) float.  Returns sigmoid(relu(max(d3, d5, d7)))."""
    N, C, H, W = x.shape
    assert C == 1, "PAM's conv weights are (1,1,k,k); input must have 1 channel"

    # Compute dtype: stay in the input dtype for f32/bf16 (bf16 is native on
    # v6e/v7x and halves the VMEM footprint), otherwise accumulate in f32.
    # TODO(synk): force float32 compute on v5e (no bf16 VPU) via chip query.
    if x.dtype in (jnp.float32, jnp.bfloat16):
        acc_dtype = x.dtype
    else:
        acc_dtype = jnp.float32

    try:
        vmem_cap = int(pltpu.get_tpu_info().vmem_capacity_bytes)
    except Exception:
        vmem_cap = 64 * 1024 * 1024      # conservative (v7x-sized) fallback

    in_isz = jnp.dtype(x.dtype).itemsize
    acc_isz = jnp.dtype(acc_dtype).itemsize
    Th, nb, Wb, est_bytes = _pick_tiling(N, H, W, in_isz, acc_isz, vmem_cap)

    n_strips = pl.cdiv(H, Th)
    n_bblocks = pl.cdiv(N, nb)
    th8 = Th // _SUBLANES
    hb8 = pl.cdiv(H, _SUBLANES)

    xs = x.reshape(N, H, W)              # drop the singleton channel (no copy)

    kernel = functools.partial(_pam_kernel, H=H, W=W, Th=Th, acc_dtype=acc_dtype)
    vmem_limit = int(min(0.9 * vmem_cap, max(32 << 20, 2 * est_bytes)))

    out = pl.pallas_call(
        kernel,
        out_shape=jax.ShapeDtypeStruct((N, H, W), x.dtype),
        grid_spec=pltpu.PrefetchScalarGridSpec(
            num_scalar_prefetch=0,
            grid=(n_bblocks, n_strips),
            in_specs=[
                # strip body
                pl.BlockSpec((nb, Th, Wb), lambda n, i: (n, i, 0)),
                # 8 rows just above the strip (clamped at the top edge; the
                # kernel zero-masks anything that maps to rows < 0)
                pl.BlockSpec((nb, HALO, Wb),
                             lambda n, i: (n, jnp.maximum(i * th8 - 1, 0), 0)),
                # 8 rows just below the strip (clamped at the bottom edge;
                # rows >= H are zero-masked in the kernel)
                pl.BlockSpec((nb, HALO, Wb),
                             lambda n, i: (n, jnp.minimum((i + 1) * th8, hb8 - 1), 0)),
            ],
            out_specs=pl.BlockSpec((nb, Th, Wb), lambda n, i: (n, i, 0)),
            scratch_shapes=[pltpu.VMEM((nb, Th + 2 * HALO, Wb), acc_dtype)],
        ),
        compiler_params=pltpu.CompilerParams(
            dimension_semantics=("parallel", "parallel"),
            vmem_limit_bytes=vmem_limit,
        ),
    )(xs, xs, xs)
    # TODO(synk): also tile the W axis for extremely wide frames (> ~16k cols);
    # currently each strip spans the full (lane-padded) width.

    return out.reshape(N, 1, H, W)


# ------------------------------ reference path ------------------------------


def _reference_weights():
    """Summed per-scale kernels, built independently from the module's 12
    directional kernels (used only to validate the constant folding)."""
    ws = []
    for k, r in ((3, 1), (5, 2), (7, 3)):
        c = k // 2
        w = np.zeros((k, k), np.float32)
        # 15 (main diag), 26 (vertical), 37 (anti-diag), 48 (horizontal)
        for (di, dj) in ((1, 1), (1, 0), (1, -1), (0, 1)):
            w[c, c] += 2.0
            w[c + r * di, c + r * dj] += -1.0
            w[c - r * di, c - r * dj] += -1.0
        ws.append(jnp.asarray(w))
    return ws


def _reference(x):
    """Pure-JAX reference matching F.conv2d(padding=k//2) + max + sigmoid(relu)."""
    def conv(img, w):
        k = w.shape[0]
        return jax.lax.conv_general_dilated(
            img, w.reshape(1, 1, k, k),
            window_strides=(1, 1),
            padding=[(k // 2, k // 2), (k // 2, k // 2)],
            dimension_numbers=("NCHW", "OIHW", "NCHW"))
    w3, w5, w7 = _reference_weights()
    d3, d5, d7 = conv(x, w3), conv(x, w5), conv(x, w7)
    dmax = jnp.maximum(jnp.maximum(d3, d5), d7)
    return jax.nn.sigmoid(jnp.maximum(dmax, 0.0))


if __name__ == "__main__":
    key0, key1 = jax.random.split(jax.random.PRNGKey(0), 2)

    # PAM operates on single-channel maps (its conv weights are (1, 1, k, k)).
    x1 = jax.random.normal(key0, (2, 1, 16, 16), dtype=jnp.float32)
    out1 = jax.block_until_ready(pam_forward(x1))
    ref1 = jax.block_until_ready(_reference(x1))
    # tolerance covers the approximate EUP reciprocal used for the sigmoid
    np.testing.assert_allclose(np.asarray(out1), np.asarray(ref1),
                               rtol=5e-3, atol=5e-3)

    # Ragged shape: exercises the in-kernel zero padding and the clipped
    # partial edge blocks (H not a multiple of 8, W not a multiple of 128).
    x2 = jax.random.normal(key1, (2, 1, 20, 30), dtype=jnp.float32)
    out2 = jax.block_until_ready(pam_forward(x2))
    ref2 = jax.block_until_ready(_reference(x2))
    np.testing.assert_allclose(np.asarray(out2), np.asarray(ref2),
                               rtol=5e-3, atol=5e-3)

    print("KERNEL_OK")
</pallas_src>

<mosaic_0001>
module attributes {stable_mosaic.version = 11 : i64} {
  func.func @_pam_kernel(%arg0: i32, %arg1: i32, %arg2: memref<1x16x128xf32, #tpu.memory_space<vmem>>, %arg3: memref<1x8x128xf32, #tpu.memory_space<vmem>>, %arg4: memref<1x8x128xf32, #tpu.memory_space<vmem>>, %arg5: memref<1x16x128xf32, #tpu.memory_space<vmem>>, %arg6: memref<1x32x128xf32, #tpu.memory_space<vmem>>) attributes {dimension_semantics = [#tpu.dimension_semantics<parallel>, #tpu.dimension_semantics<parallel>], iteration_bounds = array<i64: 2, 1>, scalar_prefetch = 0 : i64, scratch_operands = 1 : i64, tpu.core_type = #tpu.core_type<tc>, window_params = [{transform_indices = @transform_0, window_bounds = array<i64: 1, 16, 128>}, {transform_indices = @transform_1, window_bounds = array<i64: 1, 8, 128>}, {transform_indices = @transform_2, window_bounds = array<i64: 1, 8, 128>}, {transform_indices = @transform_3, window_bounds = array<i64: 1, 16, 128>}]} {
    %c16_i32 = arith.constant 16 : i32
    %0 = arith.muli %arg1, %c16_i32 : i32
    %c0 = arith.constant 0 : index
    %c0_0 = arith.constant 0 : index
    %c0_1 = arith.constant 0 : index
    %1 = vector.load %arg3[%c0, %c0_0, %c0_1] : memref<1x8x128xf32, #tpu.memory_space<vmem>>, vector<1x8x128xf32>
    %c8_i32 = arith.constant 8 : i32
    %2 = arith.subi %0, %c8_i32 : i32
    %3 = tpu.iota {dimensions = array<i32: 1>} : vector<1x8x128xi32>
    %4 = vector.broadcast %2 : i32 to vector<1x8x128xi32>
    %5 = arith.addi %3, %4 : vector<1x8x128xi32>
    %6 = tpu.iota {dimensions = array<i32: 2>} : vector<1x8x128xi32>
    %c0_i32 = arith.constant 0 : i32
    %7 = vector.broadcast %c0_i32 : i32 to vector<1x8x128xi32>
    %8 = arith.cmpi sge, %5, %7 : vector<1x8x128xi32>
    %c16_i32_2 = arith.constant 16 : i32
    %9 = vector.broadcast %c16_i32_2 : i32 to vector<1x8x128xi32>
    %10 = arith.cmpi slt, %6, %9 : vector<1x8x128xi32>
    %11 = arith.andi %8, %10 : vector<1x8x128xi1>
    %cst = arith.constant 0.000000e+00 : f32
    %12 = vector.broadcast %cst : f32 to vector<1x8x128xf32>
    %13 = arith.select %11, %1, %12 : vector<1x8x128xi1>, vector<1x8x128xf32>
    %c0_3 = arith.constant 0 : index
    %c0_4 = arith.constant 0 : index
    %c0_5 = arith.constant 0 : index
    %14 = vector.load %arg6[%c0_3, %c0_4, %c0_5] : memref<1x32x128xf32, #tpu.memory_space<vmem>>, vector<1x8x128xf32>
    tpu.vector_store %arg6[%c0_3, %c0_4, %c0_5], %13 {strides = array<i32>} : memref<1x32x128xf32, #tpu.memory_space<vmem>>, vector<1x8x128xf32>,
    %c0_6 = arith.constant 0 : index
    %c0_7 = arith.constant 0 : index
    %c0_8 = arith.constant 0 : index
    %15 = vector.load %arg2[%c0_6, %c0_7, %c0_8] : memref<1x16x128xf32, #tpu.memory_space<vmem>>, vector<1x16x128xf32>
    %16 = tpu.iota {dimensions = array<i32: 1>} : vector<1x16x128xi32>
    %17 = vector.broadcast %0 : i32 to vector<1x16x128xi32>
    %18 = arith.addi %16, %17 : vector<1x16x128xi32>
    %19 = tpu.iota {dimensions = array<i32: 2>} : vector<1x16x128xi32>
    %c16_i32_9 = arith.constant 16 : i32
    %20 = vector.broadcast %c16_i32_9 : i32 to vector<1x16x128xi32>
    %21 = arith.cmpi slt, %18, %20 : vector<1x16x128xi32>
    %c16_i32_10 = arith.constant 16 : i32
    %22 = vector.broadcast %c16_i32_10 : i32 to vector<1x16x128xi32>
    %23 = arith.cmpi slt, %19, %22 : vector<1x16x128xi32>
    %24 = arith.andi %21, %23 : vector<1x16x128xi1>
    %cst_11 = arith.constant 0.000000e+00 : f32
    %25 = vector.broadcast %cst_11 : f32 to vector<1x16x128xf32>
    %26 = arith.select %24, %15, %25 : vector<1x16x128xi1>, vector<1x16x128xf32>
    %c0_12 = arith.constant 0 : index
    %c8 = arith.constant 8 : index
    %c0_13 = arith.constant 0 : index
    %27 = vector.load %arg6[%c0_12, %c8, %c0_13] : memref<1x32x128xf32, #tpu.memory_space<vmem>>, vector<1x16x128xf32>
    tpu.vector_store %arg6[%c0_12, %c8, %c0_13], %26 {strides = array<i32>} : memref<1x32x128xf32, #tpu.memory_space<vmem>>, vector<1x16x128xf32>,
    %c0_14 = arith.constant 0 : index
    %c0_15 = arith.constant 0 : index
    %c0_16 = arith.constant 0 : index
    %28 = vector.load %arg4[%c0_14, %c0_15, %c0_16] : memref<1x8x128xf32, #tpu.memory_space<vmem>>, vector<1x8x128xf32>
    %c16_i32_17 = arith.constant 16 : i32
    %29 = arith.addi %0, %c16_i32_17 : i32
    %30 = tpu.iota {dimensions = array<i32: 1>} : vector<1x8x128xi32>
    %31 = vector.broadcast %29 : i32 to vector<1x8x128xi32>
    %32 = arith.addi %30, %31 : vector<1x8x128xi32>
    %33 = tpu.iota {dimensions = array<i32: 2>} : vector<1x8x128xi32>
    %c16_i32_18 = arith.constant 16 : i32
    %34 = vector.broadcast %c16_i32_18 : i32 to vector<1x8x128xi32>
    %35 = arith.cmpi slt, %32, %34 : vector<1x8x128xi32>
    %c16_i32_19 = arith.constant 16 : i32
    %36 = vector.broadcast %c16_i32_19 : i32 to vector<1x8x128xi32>
    %37 = arith.cmpi slt, %33, %36 : vector<1x8x128xi32>
    %38 = arith.andi %35, %37 : vector<1x8x128xi1>
    %cst_20 = arith.constant 0.000000e+00 : f32
    %39 = vector.broadcast %cst_20 : f32 to vector<1x8x128xf32>
    %40 = arith.select %38, %28, %39 : vector<1x8x128xi1>, vector<1x8x128xf32>
    %c0_21 = arith.constant 0 : index
    %c24 = arith.constant 24 : index
    %c0_22 = arith.constant 0 : index
    %41 = vector.load %arg6[%c0_21, %c24, %c0_22] : memref<1x32x128xf32, #tpu.memory_space<vmem>>, vector<1x8x128xf32>
    tpu.vector_store %arg6[%c0_21, %c24, %c0_22], %40 {strides = array<i32>} : memref<1x32x128xf32, #tpu.memory_space<vmem>>, vector<1x8x128xf32>,
    %c0_23 = arith.constant 0 : index
    %c0_24 = arith.constant 0 : index
    %c0_25 = arith.constant 0 : index
    %42 = vector.load %arg6[%c0_23, %c0_24, %c0_25] : memref<1x32x128xf32, #tpu.memory_space<vmem>>, vector<1x32x128xf32>
    %43 = vector.extract_strided_slice %42 {offsets = [0, 8, 0], sizes = [1, 16, 128], strides = [1, 1, 1]} : vector<1x32x128xf32> to vector<1x16x128xf32>
    %44 = vector.extract_strided_slice %42 {offsets = [0, 7, 0], sizes = [1, 16, 128], strides = [1, 1, 1]} : vector<1x32x128xf32> to vector<1x16x128xf32>
    %45 = vector.extract_strided_slice %42 {offsets = [0, 9, 0], sizes = [1, 16, 128], strides = [1, 1, 1]} : vector<1x32x128xf32> to vector<1x16x128xf32>
    %46 = arith.addf %44, %45 : vector<1x16x128xf32>
    %47 = vector.extract_strided_slice %42 {offsets = [0, 6, 0], sizes = [1, 16, 128], strides = [1, 1, 1]} : vector<1x32x128xf32> to vector<1x16x128xf32>
    %48 = vector.extract_strided_slice %42 {offsets = [0, 10, 0], sizes = [1, 16, 128], strides = [1, 1, 1]} : vector<1x32x128xf32> to vector<1x16x128xf32>
    %49 = arith.addf %47, %48 : vector<1x16x128xf32>
    %50 = vector.extract_strided_slice %42 {offsets = [0, 5, 0], sizes = [1, 16, 128], strides = [1, 1, 1]} : vector<1x32x128xf32> to vector<1x16x128xf32>
    %51 = vector.extract_strided_slice %42 {offsets = [0, 11, 0], sizes = [1, 16, 128], strides = [1, 1, 1]} : vector<1x32x128xf32> to vector<1x16x128xf32>
    %52 = arith.addf %50, %51 : vector<1x16x128xf32>
    %c3_i32 = arith.constant 3 : i32
    %53 = tpu.dynamic_rotate %42 by %c3_i32 dim 2 : vector<1x32x128xf32>, i32 -> vector<1x32x128xf32>
    %54 = vector.extract_strided_slice %53 {offsets = [0, 5, 0], sizes = [1, 16, 128], strides = [1, 1, 1]} : vector<1x32x128xf32> to vector<1x16x128xf32>
    %55 = vector.extract_strided_slice %53 {offsets = [0, 8, 0], sizes = [1, 16, 128], strides = [1, 1, 1]} : vector<1x32x128xf32> to vector<1x16x128xf32>
    %56 = arith.addf %54, %55 : vector<1x16x128xf32>
    %57 = vector.extract_strided_slice %53 {offsets = [0, 11, 0], sizes = [1, 16, 128], strides = [1, 1, 1]} : vector<1x32x128xf32> to vector<1x16x128xf32>
    %58 = arith.addf %56, %57 : vector<1x16x128xf32>
    %59 = arith.addf %52, %58 : vector<1x16x128xf32>
    %c2_i32 = arith.constant 2 : i32
    %60 = tpu.dynamic_rotate %42 by %c2_i32 dim 2 : vector<1x32x128xf32>, i32 -> vector<1x32x128xf32>
    %61 = vector.extract_strided_slice %60 {offsets = [0, 6, 0], sizes = [1, 16, 128], strides = [1, 1, 1]} : vector<1x32x128xf32> to vector<1x16x128xf32>
    %62 = vector.extract_strided_slice %60 {offsets = [0, 8, 0], sizes = [1, 16, 128], strides = [1, 1, 1]} : vector<1x32x128xf32> to vector<1x16x128xf32>
    %63 = arith.addf %61, %62 : vector<1x16x128xf32>
    %64 = vector.extract_strided_slice %60 {offsets = [0, 10, 0], sizes = [1, 16, 128], strides = [1, 1, 1]} : vector<1x32x128xf32> to vector<1x16x128xf32>
    %65 = arith.addf %63, %64 : vector<1x16x128xf32>
    %66 = arith.addf %49, %65 : vector<1x16x128xf32>
    %c1_i32 = arith.constant 1 : i32
    %67 = tpu.dynamic_rotate %42 by %c1_i32 dim 2 : vector<1x32x128xf32>, i32 -> vector<1x32x128xf32>
    %68 = vector.extract_strided_slice %67 {offsets = [0, 7, 0], sizes = [1, 16, 128], strides = [1, 1, 1]} : vector<1x32x128xf32> to vector<1x16x128xf32>
    %69 = vector.extract_strided_slice %67 {offsets = [0, 8, 0], sizes = [1, 16, 128], strides = [1, 1, 1]} : vector<1x32x128xf32> to vector<1x16x128xf32>
    %70 = arith.addf %68, %69 : vector<1x16x128xf32>
    %71 = vector.extract_strided_slice %67 {offsets = [0, 9, 0], sizes = [1, 16, 128], strides = [1, 1, 1]} : vector<1x32x128xf32> to vector<1x16x128xf32>
    %72 = arith.addf %70, %71 : vector<1x16x128xf32>
    %73 = arith.addf %46, %72 : vector<1x16x128xf32>
    %c127_i32 = arith.constant 127 : i32
    %74 = tpu.dynamic_rotate %42 by %c127_i32 dim 2 : vector<1x32x128xf32>, i32 -> vector<1x32x128xf32>
    %75 = vector.extract_strided_slice %74 {offsets = [0, 7, 0], sizes = [1, 16, 128], strides = [1, 1, 1]} : vector<1x32x128xf32> to vector<1x16x128xf32>
    %76 = vector.extract_strided_slice %74 {offsets = [0, 8, 0], sizes = [1, 16, 128], strides = [1, 1, 1]} : vector<1x32x128xf32> to vector<1x16x128xf32>
    %77 = arith.addf %75, %76 : vector<1x16x128xf32>
    %78 = vector.extract_strided_slice %74 {offsets = [0, 9, 0], sizes = [1, 16, 128], strides = [1, 1, 1]} : vector<1x32x128xf32> to vector<1x16x128xf32>
    %79 = arith.addf %77, %78 : vector<1x16x128xf32>
    %80 = arith.addf %73, %79 : vector<1x16x128xf32>
    %c126_i32 = arith.constant 126 : i32
    %81 = tpu.dynamic_rotate %42 by %c126_i32 dim 2 : vector<1x32x128xf32>, i32 -> vector<1x32x128xf32>
    %82 = vector.extract_strided_slice %81 {offsets = [0, 6, 0], sizes = [1, 16, 128], strides = [1, 1, 1]} : vector<1x32x128xf32> to vector<1x16x128xf32>
    %83 = vector.extract_strided_slice %81 {offsets = [0, 8, 0], sizes = [1, 16, 128], strides = [1, 1, 1]} : vector<1x32x128xf32> to vector<1x16x128xf32>
    %84 = arith.addf %82, %83 : vector<1x16x128xf32>
    %85 = vector.extract_strided_slice %81 {offsets = [0, 10, 0], sizes = [1, 16, 128], strides = [1, 1, 1]} : vector<1x32x128xf32> to vector<1x16x128xf32>
    %86 = arith.addf %84, %85 : vector<1x16x128xf32>
    %87 = arith.addf %66, %86 : vector<1x16x128xf32>
    %c125_i32 = arith.constant 125 : i32
    %88 = tpu.dynamic_rotate %42 by %c125_i32 dim 2 : vector<1x32x128xf32>, i32 -> vector<1x32x128xf32>
    %89 = vector.extract_strided_slice %88 {offsets = [0, 5, 0], sizes = [1, 16, 128], strides = [1, 1, 1]} : vector<1x32x128xf32> to vector<1x16x128xf32>
    %90 = vector.extract_strided_slice %88 {offsets = [0, 8, 0], sizes = [1, 16, 128], strides = [1, 1, 1]} : vector<1x32x128xf32> to vector<1x16x128xf32>
    %91 = arith.addf %89, %90 : vector<1x16x128xf32>
    %92 = vector.extract_strided_slice %88 {offsets = [0, 11, 0], sizes = [1, 16, 128], strides = [1, 1, 1]} : vector<1x32x128xf32> to vector<1x16x128xf32>
    %93 = arith.addf %91, %92 : vector<1x16x128xf32>
    %94 = arith.addf %59, %93 : vector<1x16x128xf32>
    %95 = arith.minimumf %80, %87 : vector<1x16x128xf32>
    %96 = arith.minimumf %95, %94 : vector<1x16x128xf32>
    %cst_26 = arith.constant 8.000000e+00 : f32
    %97 = vector.broadcast %cst_26 : f32 to vector<1x16x128xf32>
    %98 = arith.mulf %97, %43 : vector<1x16x128xf32>
    %99 = arith.subf %98, %96 : vector<1x16x128xf32>
    %cst_27 = arith.constant 0.000000e+00 : f32
    %100 = vector.broadcast %cst_27 : f32 to vector<1x16x128xf32>
    %101 = arith.maximumf %99, %100 : vector<1x16x128xf32>
    %cst_28 = arith.constant 0.000000e+00 : f32
    %102 = vector.broadcast %cst_28 : f32 to vector<1x16x128xf32>
    %103 = arith.subf %102, %101 : vector<1x16x128xf32>
    %104 = math.exp %103 : vector<1x16x128xf32>
    %cst_29 = arith.constant 1.000000e+00 : f32
    %105 = vector.broadcast %cst_29 : f32 to vector<1x16x128xf32>
    %106 = arith.addf %105, %104 : vector<1x16x128xf32>
    %107 = tpu.reciprocal %106 {approx = true} : vector<1x16x128xf32> -> vector<1x16x128xf32>
    %c0_30 = arith.constant 0 : index
    %c0_31 = arith.constant 0 : index
    %c0_32 = arith.constant 0 : index
    %108 = vector.load %arg5[%c0_30, %c0_31, %c0_32] : memref<1x16x128xf32, #tpu.memory_space<vmem>>, vector<1x16x128xf32>
    tpu.vector_store %arg5[%c0_30, %c0_31, %c0_32], %107 {strides = array<i32>} : memref<1x16x128xf32, #tpu.memory_space<vmem>>, vector<1x16x128xf32>,
    return
  }
  func.func @transform_0(%arg0: i32, %arg1: i32) -> (i32, i32, i32) {
    %c0_i32 = arith.constant 0 : i32
    %c0_i32_0 = arith.constant 0 : i32
    return %arg0, %arg1, %c0_i32 : i32, i32, i32
  }
  func.func @transform_1(%arg0: i32, %arg1: i32) -> (i32, i32, i32) {
    %c2_i32 = arith.constant 2 : i32
    %0 = arith.muli %arg1, %c2_i32 : i32
    %c1_i32 = arith.constant 1 : i32
    %1 = arith.subi %0, %c1_i32 : i32
    %c0_i32 = arith.constant 0 : i32
    %2 = arith.maxsi %1, %c0_i32 : i32
    %c0_i32_0 = arith.constant 0 : i32
    %c0_i32_1 = arith.constant 0 : i32
    return %arg0, %2, %c0_i32_0 : i32, i32, i32
  }
  func.func @transform_2(%arg0: i32, %arg1: i32) -> (i32, i32, i32) {
    %c1_i32 = arith.constant 1 : i32
    %0 = arith.addi %arg1, %c1_i32 : i32
    %c2_i32 = arith.constant 2 : i32
    %1 = arith.muli %0, %c2_i32 : i32
    %c1_i32_0 = arith.constant 1 : i32
    %2 = arith.minsi %1, %c1_i32_0 : i32
    %c0_i32 = arith.constant 0 : i32
    %c0_i32_1 = arith.constant 0 : i32
    return %arg0, %2, %c0_i32 : i32, i32, i32
  }
  func.func @transform_3(%arg0: i32, %arg1: i32) -> (i32, i32, i32) {
    %c0_i32 = arith.constant 0 : i32
    %c0_i32_0 = arith.constant 0 : i32
    return %arg0, %arg1, %c0_i32 : i32, i32, i32
  }
}

</mosaic_0001>

<bundles_post_ra>
// kernel: pam_forward.1
= control target key start
LH: loop header
LB: loop body
LE: loop exit
PB: predicated region body
PF: predicated region fallthrough
CT: control target
= control target key end

     0   :  { %s1559_s0 = inlined_call_operand.hbm [shape: f32[2,16,16], index: 0, kind: input, shape index: {}, may-alias: {0,1,2}]   ;;  %s1560_s1 = inlined_call_operand.hbm [shape: f32[2,16,16], index: 1, kind: input, shape index: {}, may-alias: {0,1,2}]   ;;  %s1561_s2 = inlined_call_operand.hbm [shape: f32[2,16,16], index: 2, kind: input, shape index: {}, may-alias: {0,1,2}]   ;;  %s1562_s3 = inlined_call_operand.hbm [shape: f32[2,16,16], index: 3, kind: output, shape index: {}]  }
   0x1   :  { %1569 = sst [smem:[#allocation16_spill]] %s1559_s0 }
   0x2   :  { %1570 = sst [smem:[#allocation17_spill]] %s1560_s1 }
   0x3   :  { %8 = vsyncpa [#allocation4], 0 }
   0x4   :  { %10 = vsyncpa [#allocation4 + $0x1], 0 }
   0x5   :  { %11 = vsyncpa [#allocation7], 0 }
   0x6   :  { %13 = vsyncpa [#allocation7 + $0x1], 0 }
   0x7   :  { %14 = vsyncpa [#allocation5], 0 }
   0x8   :  { %16 = vsyncpa [#allocation5 + $0x1], 0  ;;  %s1181_s12 = smov 0   ;;  %s1183_s13 = smov 0  }
   0x9   :  { %s1185_s14 = smov 0   ;;  %s1187_s15 = smov 0  }
   0xa   :  { %s1189_s16 = smov 0   ;;  %s1191_s17 = smov 0  }
   0xb LB: > { %1571 = sst [smem:[#allocation13_spill]] %s1140_s16  ;;  %s1212_s18 = sadd.s32 4294967295, %s1144_s17   ;;  %s1144_s17 = sphi %s1191_s17, %s22_s17   ;;  %s1140_s16 = sphi %s1189_s16, %s1592_s16   ;;  %s1136_s15 = sphi %s1187_s15, %s1591_s15   ;;  %s1132_s14 = sphi %s1185_s14, %s1595_s14   ;;  %s1128_s13 = sphi %s1183_s13, %s1594_s13   ;;  %s1124_s12 = sphi %s1181_s12, %s1593_s12  }
   0xc   : > { %s813_s19 = sadd.s32 4294967294, %s1144_s17   ;;  %s34_s20 = sadd.s32 1, %s1140_s16 }
   0xd   : > { %s43_s21 = sadd.s32 1, %s1132_s14  ;;  %p36_p0 = scmp.ge.s32.totalorder %s34_s20, 2 }
   0xe   : > { %p50_p1 = scmp.ne.s32.totalorder %s1132_s14, %s1128_s13  ;;  %p51_p2 = scmp.eq.s32.totalorder %s1144_s17, 0 }
   0xf   : > { %p56_p3 = scmp.ne.s32.totalorder %s1128_s13, %s1124_s12  ;;  %s1597_s20 = smov (%p36_p0, %s34_s20), 0 }
  0x10   : > { %1572 = sst [smem:[#allocation14_spill]] %s1597_s20  ;;  %p1224_p4 = por %p51_p2, %p50_p1 }
  0x11   : > { %p57_p5 = scmp.eq.s32.totalorder %s1212_s18, 0  ;;  %s38_s23 = ssub.s32 %s1140_s16, %s1597_s20 }
  0x12   : > { %p154_p6 = scmp.eq.s32.totalorder %s1212_s18, 1  ;;  %p41_p7 = scmp.eq.s32.totalorder %s38_s23, 0 }
  0x13   : > { %p1232_p8 = por %p57_p5, %p56_p3  ;;  %p160_p10 = scmp.eq.s32.totalorder %s813_s19, 1 }
  0x14   : > { %p1236_p9 = por %p154_p6, %p50_p1  ;;  %p863_p13 = scmp.lt.s32.totalorder %s1144_s17, 2 }
  0x15   : > { %s1574_s24 = scalar_select %p1232_p8, 1, 0 }
  0x16   : > { %s1575_s25 = scalar_select %p1236_p9, 1, 0 }
  0x17   : > { %s1241_s26 = scalar_select %p41_p7, %s1132_s14, %s43_s21  }
  0x18   : > { %p1243_p11 = por %p160_p10, %p56_p3  ;;  %s1250_s28 = sand.u32 1, %s1132_s14  }
  0x19   : > { %1576 = sst [smem:[#allocation15_spill]] %s1241_s26  ;;  %s1253_s29 = sshll.u32 %s1140_s16, 8 }
  0x1a   : > { %s1577_s27 = scalar_select %p1243_p11, 1, 0 }
  0x1b   : > { %s203_s30 = sand.u32 1, %s1144_s17   ;;  %s1578_s0 = sld [smem:[#allocation16_spill]] }
  0x1c   : > { %p1264_p0 = pnand %p863_p13, %p1224_p4  ;;  %s1563_s8 = sshll.u32 %s1250_s28, 3 }
  0x1d   : > { %s1580_s1 = sld [smem:[#allocation17_spill]]  ;;  %s207_s19 = scalar_lea.vmem [#allocation6], %s1563_s8 }
  0x1e   : > { %s1579_s7 = scalar_select %p1264_p0, 1, 0 }
  0x1f   : > { %s220_s21 = sshll.u32 %s207_s19, 4  ;;  %s1279_s22 = scalar_lea.sflag [#allocation7], %s203_s30  ;;  %s1277_s21 = int_to_ptr.vmem [resolvable:$true] %s220_s21 }
  0x20   : > { %p1285_p2 = pneg %p1264_p0 }
  0x21   : > { %s1260_s6 = scalar_lea.hbm %s1578_s0, %s1253_s29 }
  0x23   : > { %s1273_s11 = scalar_lea.hbm %s1580_s1, %s1253_s29  ;;  %s973_s10 = scalar_lea.hbm %s1580_s1, 512 }
  0x24   : > { %s968_s23 = scalar_lea.hbm %s1273_s11, 128  ;;  %p974_p5 = scmp.lt.u32.totalorder %s1273_s11, %s1580_s1 }
  0x25   : > { %p969_p1 = scmp.ne.s32.totalorder %s1273_s11, %s968_s23  ;;  %p975_p6 = scmp.lt.u32.totalorder %s973_s10, %s968_s23 }
  0x26   : > { %p977_p10 = scmp.lt.u32.totalorder %s968_s23, %s1273_s11 }
  0x27   : > { %p971_p3 = pnand %p1285_p2, %p969_p1  ;;  %p976_p7 = por %p975_p6, %p974_p5 }
  0x29   : > { %p972_p4 = pneg %p971_p3  ;;  %p978_p13 = por %p977_p10, %p976_p7 }
  0x2b   : > { %p979_p12 = pnand %p978_p13, %p972_p4 }
  0x2d   : > { %982 = shalt.err (!%p979_p12)
}
  0x2e   : > { %s983_s30 = scalar_lea.vmem %s1277_s21, 128  ;;  %s1146_s5 = smov [#allocation6]  }
  0x2f   : > { %p984_p1 = scmp.ne.s32.totalorder %s1277_s21, %s983_s30  ;;  %s988_s9 = sshll.u32 %s1146_s5, 4  ;;  %s989_s9 = int_to_ptr.vmem [resolvable:$false] %s988_s9 }
  0x30   : > { %s990_s8 = scalar_lea.vmem %s989_s9, 256  ;;  %p991_p9 = scmp.lt.s32.totalorder %s1277_s21, %s989_s9 }
  0x31   : > { %p986_p3 = pnand %p984_p1, %p1285_p2  ;;  %p992_p8 = scmp.lt.s32.totalorder %s990_s8, %s983_s30 }
  0x33   : > { %p987_p11 = pneg %p986_p3  ;;  %p993_p5 = por %p992_p8, %p991_p9 }
  0x35   : > { %p994_p6 = pnand %p993_p5, %p987_p11 }
  0x37   : > { %997 = shalt.err (!%p994_p6)
}
  0x38   : > { %855 = dma.hbm_to_vmem [thread:$0]  (!%p1264_p0), %s1273_s11, 128, %s1277_s21, %s1279_s22  }
  0x39   : > { %p825_p12 = scmp.ge.s32.totalorder %s1144_s17, 1  ;;  %p249_p4 = scmp.lt.s32.totalorder %s1144_s17, 3 }
  0x3a   : > { %s816_s10 = sshll.u32 %s1250_s28, 4  ;;  %s838_s5 = sadd.s32 128, %s1253_s29 }
  0x3b   : > { %p1311_p8 = pnand %p825_p12, %p249_p4  ;;  %s184_s19 = scalar_lea.vmem [#allocation3], %s816_s10 }
  0x3c   : > { %s193_s30 = sshll.u32 %s184_s19, 4  ;;  %s1322_s1 = scalar_lea.hbm %s1561_s2, %s838_s5  ;;  %s1317_s30 = int_to_ptr.vmem [resolvable:$true] %s193_s30 }
  0x3d   : > { %s1582_s23 = scalar_select %p1311_p8, 1, 0 }
  0x3e   : > { %s181_s11 = scalar_lea.sflag [#allocation4], %s1250_s28  ;;  %s998_s21 = scalar_lea.hbm %s1260_s6, 256 }
  0x3f   : > { %p999_p9 = scmp.ne.s32.totalorder %s1260_s6, %s998_s21  ;;  %s1003_s26 = scalar_lea.hbm %s1578_s0, 512 }
  0x40   : > { %p1004_p10 = scmp.lt.u32.totalorder %s1260_s6, %s1578_s0  ;;  %p1005_p13 = scmp.lt.u32.totalorder %s1003_s26, %s998_s21 }
  0x41   : > { %p1001_p11 = pnand %p999_p9, %p1285_p2  ;;  %p1007_p3 = scmp.lt.u32.totalorder %s998_s21, %s1260_s6 }
  0x42   : > { %p1006_p1 = por %p1005_p13, %p1004_p10 }
  0x43   : > { %p1002_p7 = pneg %p1001_p11 }
  0x44   : > { %p1008_p5 = por %p1007_p3, %p1006_p1 }
  0x46   : > { %p1009_p6 = pnand %p1008_p5, %p1002_p7 }
  0x48   : > { %1012 = shalt.err (!%p1009_p6)
}
  0x49   : > { %s1013_s29 = scalar_lea.vmem %s1317_s30, 256  ;;  %s1147_s16 = smov [#allocation3]  }
  0x4a   : > { %p1014_p12 = scmp.ne.s32.totalorder %s1317_s30, %s1013_s29  ;;  %s1018_s20 = sshll.u32 %s1147_s16, 4  ;;  %s1019_s20 = int_to_ptr.vmem [resolvable:$false] %s1018_s20 }
  0x4b   : > { %s1020_s5 = scalar_lea.vmem %s1019_s20, 512  ;;  %p1021_p11 = scmp.lt.s32.totalorder %s1317_s30, %s1019_s20 }
  0x4c   : > { %p1016_p4 = pnand %p1014_p12, %p1285_p2  ;;  %p1022_p8 = scmp.lt.s32.totalorder %s1020_s5, %s1013_s29 }
  0x4e   : > { %p1017_p9 = pneg %p1016_p4  ;;  %p1023_p10 = por %p1022_p8, %p1021_p11 }
  0x50   : > { %p1024_p13 = pnand %p1023_p10, %p1017_p9 }
  0x52   : > { %1027 = shalt.err (!%p1024_p13)
}
  0x53   : > { %s1148_s26 = smov 128   ;;  %s1149_s9 = smov 8  }
  0x54   : > { %852 = dma.hbm_to_vmem [thread:$0]  (!%p1264_p0), %s1260_s6, 256, %s1317_s30, %s181_s11, %s1148_s26, %s1148_s26, %s1149_s9  }
  0x55   : > { %s1583_s8 = sshll.u32 %s1250_s28, 3  ;;  %s1028_s19 = scalar_lea.hbm %s1322_s1, 128 }
  0x56   : > { %s231_s21 = scalar_lea.vmem [#allocation8], %s1583_s8  ;;  %p1029_p8 = scmp.ne.s32.totalorder %s1322_s1, %s1028_s19 }
  0x57   : > { %s244_s10 = sshll.u32 %s231_s21, 4  ;;  %s1033_s20 = scalar_lea.hbm %s1561_s2, 512  ;;  %s245_s10 = int_to_ptr.vmem [resolvable:$true] %s244_s10 }
  0x58   : > { %p1031_p7 = pnand %p1029_p8, %p1285_p2  ;;  %p1034_p3 = scmp.lt.u32.totalorder %s1322_s1, %s1561_s2 }
  0x59   : > { %p1035_p5 = scmp.lt.u32.totalorder %s1033_s20, %s1028_s19  ;;  %p1037_p12 = scmp.lt.u32.totalorder %s1028_s19, %s1322_s1 }
  0x5a   : > { %p1032_p1 = pneg %p1031_p7 }
  0x5b   : > { %p1036_p6 = por %p1035_p5, %p1034_p3 }
  0x5d   : > { %p1038_p4 = por %p1037_p12, %p1036_p6 }
  0x5f   : > { %p1039_p9 = pnand %p1038_p4, %p1032_p1 }
  0x61   : > { %1042 = shalt.err (!%p1039_p9)
}
  0x62   : > { %s1043_s28 = scalar_lea.vmem %s245_s10, 128  ;;  %s1150_s6 = smov [#allocation8]  }
  0x63   : > { %p1044_p11 = scmp.ne.s32.totalorder %s245_s10, %s1043_s28  ;;  %s1048_s30 = sshll.u32 %s1150_s6, 4  ;;  %s1049_s30 = int_to_ptr.vmem [resolvable:$false] %s1048_s30 }
  0x64   : > { %s1050_s11 = scalar_lea.vmem %s1049_s30, 256  ;;  %p1051_p8 = scmp.lt.s32.totalorder %s245_s10, %s1049_s30 }
  0x65   : > { %p1046_p10 = pnand %p1044_p11, %p1285_p2  ;;  %p1052_p7 = scmp.lt.s32.totalorder %s1050_s11, %s1043_s28 }
  0x67   : > { %p1047_p13 = pneg %p1046_p10  ;;  %p1053_p0 = por %p1052_p7, %p1051_p8 }
  0x69   : > { %p1054_p3 = pnand %p1053_p0, %p1047_p13 }
  0x6b   : > { %1057 = shalt.err (!%p1054_p3)
}
  0x6c   : > { %p1584_p5 = scmp.ne.s32.totalorder %s1579_s7, 0  ;;  %p1585_p1 = scmp.ne.s32.totalorder %s1582_s23, 0 }
  0x6d   : > { %s1371_s0 = sand.u32 (!%p1585_p1), 1, %s1128_s13   ;;  %p1586_p0 = scmp.ne.s32.totalorder (!%p1585_p1), %s1574_s24, 0 }
  0x6e   : > { %858 = dma.hbm_to_vmem [thread:$0]  (!%p1584_p5), %s1322_s1, 128, %s245_s10, %s1279_s22  }
  0x6f   : > { %253 = sbr.rel (%p1585_p1) target bundleno = 338 (0x152), region = 32  ;;  %s826_s4 = sshll.u32 (!%p1585_p1), %s1371_s0, 4 }
  0x70   : > { %s256_s26 = scalar_lea.sflag (!%p1585_p1), [#allocation4], %s1371_s0  ;;  %s259_s9 = scalar_lea.vmem (!%p1585_p1), [#allocation3], %s826_s4 }
  0x76   : > { %1111 = dma.done.wait (%p1586_p0), %s256_s26, 256  }
  0x77   : > { %1113 = vsyncadd (%p1586_p0), %s256_s26, 4294967040  ;;  %s264_s1 = sand.u32 1, %s1212_s18  }
  0x78   : > { %s265_s7 = scalar_lea.sflag [#allocation7], %s264_s1 }
  0x79   : > { %1115 = dma.done.wait (%p1586_p0), %s265_s7, 256  }
  0x7a   : > { %1117 = vsyncadd (%p1586_p0), %s265_s7, 4294967040  ;;  %v327_v0 = vlaneseq  ;;  %v1151_v2 = vmov 0.0   ;;  %s1152_s22 = smov 2   ;;  %v334_v3 = vld [vmem:[%s259_s9] sm:$0xff]  ;;  %v335_v4 = vld [vmem:[%s259_s9 + $0x8] sm:$0xff]  ;;  %vm375_vm1 = vcmask 1043456  }
  0x7b   : > { %925 = vrot.lane.b32.xlu0 %v1151_v2, %s1152_s22  ;;  %v379_v5 = vrot.slane %v1151_v2, 4  ;;  %s1153_s18 = smov 3   ;;  %vm387_vm2 = vcmask 1041408   ;;  %vm363_vm3 = vcmask 1045504   ;;  %v391_v20 = vrot.slane %v1151_v2, 6  ;;  %s1154_s24 = smov 126  }
  0x7c   : > { %v328_v1 = vand.u32 127, %v327_v0  ;;  %s1155_s23 = smov 1   ;;  %v367_v25 = vrot.slane %v1151_v2, 2  ;;  %s1156_s8 = smov 125   ;;  %vm409_vm4 = vcmask 1044480   ;;  %vm478_vm5 = vcmask 1046528  }
  0x7d   : > { %s1157_s21 = smov 127   ;;  %vm608_vm6 = vcmask 1040384   ;;  %s839_s10 = sshll.u32 %s1136_s15, 8 }
  0x7e   : > { %vm330_vm0 = vcmp.lt.s32.totalorder %v328_v1, 16  ;;  %s309_s19 = scalar_lea.vmem [#allocation9], %s826_s4  ;;  %s1508_s5 = scalar_lea.hbm %s1562_s3, %s839_s10 }
  0x7f   : > { %v1386_v6 = vsel %vm330_vm0, %v334_v3, 0.0  ;;  %v1388_v7 = vsel %vm330_vm0, %v335_v4, 0.0  ;;  %s678_s29 = sshll.u32 %s309_s19, 4  ;;  %s663_s28 = scalar_lea.sflag [#allocation5], %s1371_s0  ;;  %s1510_s29 = int_to_ptr.vmem [resolvable:$true] %s678_s29 }
  0x80   : > { %401 = vrot.lane.b32.xlu1 %v1386_v6, %s1153_s18  ;;  %436 = vrot.lane.b32.xlu0 %v1386_v6, %s1152_s22  ;;  %v376_v8 = vrot.slane %v1386_v6, 4  ;;  %v377_v9 = vrot.slane %v1388_v7, 4  ;;  %v389_v10 = vrot.slane %v1388_v7, 6  ;;  %v388_v11 = vrot.slane %v1386_v6, 6  ;;  %s1058_s6 = scalar_lea.vmem %s1510_s29, 256  ;;  %p1587_p6 = scmp.ne.s32.totalorder %s1575_s25, 0 }
  0x81   : > { %v365_v18 = vrot.slane %v1388_v7, 2  ;;  %v364_v19 = vrot.slane %v1386_v6, 2  ;;  %p1059_p2 = scmp.ne.s32.totalorder %s1510_s29, %s1058_s6  ;;  %s1158_s15 = smov [#allocation9]  }
  0x82   : > { %v380_v12 = vsel %vm375_vm1, %v377_v9, %v379_v5  ;;  %v378_v13 = vsel %vm375_vm1, %v376_v8, %v377_v9  ;;  %v390_v14 = vsel %vm387_vm2, %v388_v11, %v389_v10  ;;  %v392_v22 = vsel %vm387_vm2, %v389_v10, %v391_v20  ;;  %s1062_s30 = sshll.u32 %s1158_s15, 4  ;;  %s1063_s30 = int_to_ptr.vmem [resolvable:$false] %s1062_s30 }
  0x83   : > { %v1405_v15 = vadd.f32 %v380_v12, %v1388_v7  ;;  %v1408_v16 = vadd.f32 %v378_v13, %v1386_v6  ;;  %v1411_v17 = vadd.f32 %v390_v14, %v1386_v6  ;;  %v366_v21 = vsel %vm363_vm3, %v364_v19, %v365_v18  ;;  %p1060_p12 = pnand %p1059_p2, %p1587_p6  ;;  %s1064_s11 = scalar_lea.vmem %s1063_s30, 512 }
  0x84   : > { %403 = vrot.lane.b32.xlu1 %v1388_v7, %s1153_s18  ;;  %438 = vrot.lane.b32.xlu0 %v1388_v7, %s1152_s22  ;;  %v1423_v23 = vadd.f32 %v366_v21, %v1386_v6  ;;  %v1428_v24 = vadd.f32 %v392_v22, %v1388_v7  ;;  %v368_v26 = vsel %vm363_vm3, %v365_v18, %v367_v25  ;;  %p1065_p9 = scmp.lt.s32.totalorder %s1510_s29, %s1063_s30  ;;  %p1066_p11 = scmp.lt.s32.totalorder %s1064_s11, %s1058_s6 }
  0x85   : > { %v1435_v27 = vadd.f32 %v368_v26, %v1388_v7  ;;  %p1061_p4 = pneg %p1060_p12 }
  0x86   : > { %p1067_p10 = por %p1066_p11, %p1065_p9 }
  0x88   : > { %539 = vrot.lane.b32.xlu1 %v1386_v6, %s1154_s24  ;;  %541 = vrot.lane.b32.xlu0 %v1388_v7, %s1154_s24  ;;  %p1068_p13 = pnand %p1067_p10, %p1061_p4 }
  0x8c   : > { %470 = vrot.lane.b32.xlu1 %v1386_v6, %s1155_s23  ;;  %472 = vrot.lane.b32.xlu0 %v1388_v7, %s1155_s23 }
  0x90   : > { %930 = vrot.lane.b32.xlu1 %v1151_v2, %s1153_s18  ;;  %935 = vrot.lane.b32.xlu0 %v1151_v2, %s1154_s24 }
  0x94   : > { %573 = vrot.lane.b32.xlu1 %v1386_v6, %s1156_s8  ;;  %575 = vrot.lane.b32.xlu0 %v1388_v7, %s1156_s8 }
  0x98   : > { %940 = vrot.lane.b32.xlu1 %v1151_v2, %s1155_s23  ;;  %505 = vrot.lane.b32.xlu0 %v1386_v6, %s1157_s21 }
  0x9c   : > { %507 = vrot.lane.b32.xlu1 %v1388_v7, %s1157_s21  ;;  %945 = vrot.lane.b32.xlu0 %v1151_v2, %s1156_s8 }
  0xa0   : > { %950 = vrot.lane.b32.xlu1 %v1151_v2, %s1157_s21 }
  0xed   : > { %v926_v28 = vpop.permute.xlu0 %925 }
  0xee   : > { %v927_v35 = vunpack.i.l.bf16 %v926_v28 }
  0xf0   : > { %v457_v44 = vrot.slane %v927_v35, 4 }
  0xf2   : > { %v1441_v29 = vpop.permute.xlu1 %401  ;;  %v437_v30 = vpop.permute.xlu0 %436 }
  0xf3   : > { %v444_v33 = vrot.slane %v437_v30, 2  ;;  %v454_v42 = vrot.slane %v437_v30, 4  ;;  %v410_v45 = vrot.slane %v1441_v29, 3  ;;  %v420_v63 = vrot.slane %v1441_v29, 6 }
  0xf5   : > { %v962_v41 = vadd.high.f32.bf16 %v444_v33, %v926_v28 }
  0xf6   : > { %v1443_v31 = vpop.permute.xlu1 %403  ;;  %v439_v32 = vpop.permute.xlu0 %438 }
  0xf7   : > { %v445_v34 = vrot.slane %v439_v32, 2  ;;  %v411_v36 = vrot.slane %v1443_v31, 3  ;;  %v455_v38 = vrot.slane %v439_v32, 4  ;;  %v462_v56 = vadd.f32 %v962_v41, %v454_v42 }
  0xf8   : > { %v421_v57 = vrot.slane %v1443_v31, 6 }
  0xf9   : > { %v446_v37 = vsel %vm363_vm3, %v444_v33, %v445_v34  ;;  %v452_v48 = vadd.f32 %v445_v34, %v439_v32  ;;  %v412_v51 = vsel %vm409_vm4, %v410_v45, %v411_v36  ;;  %v458_v52 = vsel %vm375_vm1, %v455_v38, %v457_v44 }
  0xfa   : > { %v540_v39 = vpop.permute.xlu1 %539  ;;  %v542_v40 = vpop.permute.xlu0 %541  ;;  %v451_v46 = vadd.f32 %v446_v37, %v437_v30  ;;  %v456_v58 = vsel %vm375_vm1, %v454_v42, %v455_v38  ;;  %v417_v0 = vadd.f32 %v412_v51, %v1441_v29  ;;  %v465_v9 = vadd.f32 %v462_v56, %v376_v8 }
  0xfb   : > { %v547_v43 = vrot.slane %v540_v39, 2  ;;  %v548_v47 = vrot.slane %v542_v40, 2  ;;  %v557_v49 = vrot.slane %v540_v39, 4  ;;  %v558_v50 = vrot.slane %v542_v40, 4 }
  0xfc   : > { %v463_v60 = vadd.f32 %v456_v58, %v451_v46  ;;  %v464_v1 = vadd.f32 %v458_v52, %v452_v48  ;;  %v418_v10 = vadd.f32 %v411_v36, %v1443_v31  ;;  %v422_v12 = vsel %vm387_vm2, %v420_v63, %v421_v57 }
  0xfd   : > { %v549_v53 = vsel %vm363_vm3, %v547_v43, %v548_v47  ;;  %v559_v2 = vsel %vm375_vm1, %v557_v49, %v558_v50  ;;  %v429_v21 = vadd.f32 %v422_v12, %v417_v0  ;;  %v555_v32 = vadd.f32 %v548_v47, %v542_v40 }
  0xfe   : > { %v1451_v54 = vpop.permute.xlu1 %470  ;;  %v1453_v55 = vpop.permute.xlu0 %472  ;;  %v554_v59 = vadd.f32 %v549_v53, %v540_v39  ;;  %v466_v14 = vadd.f32 %v463_v60, %v1408_v16  ;;  %v467_v22 = vadd.f32 %v464_v1, %v1405_v15 }
  0xff   : > { %v479_v61 = vrot.slane %v1451_v54, 1  ;;  %v480_v62 = vrot.slane %v1453_v55, 1  ;;  %v489_v25 = vrot.slane %v1451_v54, 2  ;;  %v490_v28 = vrot.slane %v1453_v55, 2 }
 0x100   : > { %v566_v3 = vadd.f32 %v559_v2, %v554_v59  ;;  %v432_v41 = vadd.f32 %v429_v21, %v1411_v17 }
 0x101   : > { %v481_v18 = vsel %vm478_vm5, %v479_v61, %v480_v62  ;;  %v487_v60 = vadd.f32 %v480_v62, %v1453_v55 }
 0x102   : > { %v931_v4 = vpop.permute.xlu1 %930  ;;  %v936_v5 = vpop.permute.xlu0 %935  ;;  %v569_v26 = vadd.f32 %v566_v3, %v466_v14  ;;  %v486_v33 = vadd.f32 %v481_v18, %v1451_v54 }
 0x103   : > { %v932_v13 = vunpack.i.l.bf16 %v931_v4  ;;  %v937_v20 = vunpack.i.l.bf16 %v936_v5  ;;  %v963_v8 = vadd.high.f32.bf16 %v547_v43, %v936_v5  ;;  %v964_v15 = vadd.high.f32.bf16 %v410_v45, %v931_v4 }
 0x104   : > { %v610_v44 = vrot.slane %v569_v26, 7  ;;  %v491_v43 = vsel %vm363_vm3, %v489_v25, %v490_v28 }
 0x105   : > { %v560_v29 = vrot.slane %v937_v20, 4  ;;  %v423_v34 = vrot.slane %v932_v13, 6  ;;  %v565_v35 = vadd.f32 %v963_v8, %v557_v49  ;;  %v498_v51 = vadd.f32 %v491_v43, %v486_v33 }
 0x106   : > { %v574_v30 = vpop.permute.xlu1 %573  ;;  %v576_v31 = vpop.permute.xlu0 %575  ;;  %v428_v54 = vadd.f32 %v964_v15, %v420_v63 }
 0x107   : > { %v581_v16 = vrot.slane %v574_v30, 3  ;;  %v561_v36 = vsel %vm375_vm1, %v558_v50, %v560_v29  ;;  %v591_v37 = vrot.slane %v574_v30, 6  ;;  %v582_v38 = vrot.slane %v576_v31, 3 }
 0x108   : > { %v567_v39 = vadd.f32 %v561_v36, %v555_v32  ;;  %v592_v42 = vrot.slane %v576_v31, 6  ;;  %v1475_v46 = vadd.f32 %v565_v35, %v465_v9  ;;  %v424_v50 = vsel %vm387_vm2, %v421_v57, %v423_v34 }
 0x109   : > { %v583_v40 = vsel %vm409_vm4, %v581_v16, %v582_v38  ;;  %v430_v5 = vadd.f32 %v424_v50, %v418_v10  ;;  %v431_v18 = vadd.f32 %v428_v54, %v388_v11  ;;  %v501_v55 = vadd.f32 %v498_v51, %v1423_v23 }
 0x10a   : > { %v941_v47 = vpop.permute.xlu1 %940  ;;  %v506_v48 = vpop.permute.xlu0 %505  ;;  %v570_v49 = vadd.f32 %v567_v39, %v467_v22  ;;  %v588_v52 = vadd.f32 %v583_v40, %v574_v30  ;;  %v609_v45 = vrot.slane %v1475_v46, 7  ;;  %v593_v53 = vsel %vm387_vm2, %v591_v37, %v592_v42 }
 0x10b   : > { %v942_v17 = vunpack.i.l.bf16 %v941_v47  ;;  %v513_v59 = vrot.slane %v506_v48, 1  ;;  %v965_v1 = vadd.high.f32.bf16 %v479_v61, %v941_v47  ;;  %v523_v9 = vrot.slane %v506_v48, 2 }
 0x10c   : > { %v612_v56 = vrot.slane %v570_v49, 7  ;;  %v600_v58 = vadd.f32 %v593_v53, %v588_v52  ;;  %v611_v0 = vsel %vm608_vm6, %v609_v45, %v610_v44  ;;  %v433_v30 = vadd.f32 %v430_v5, %v1428_v24 }
 0x10d   : > { %v492_v2 = vrot.slane %v942_v17, 2  ;;  %v497_v62 = vadd.f32 %v965_v1, %v489_v25  ;;  %v589_v32 = vadd.f32 %v582_v38, %v576_v31  ;;  %v635_v54 = vmul.f32 8.0, %v1388_v7 }
 0x10e   : > { %v508_v3 = vpop.permute.xlu1 %507  ;;  %v946_v4 = vpop.permute.xlu0 %945  ;;  %v613_v63 = vsel %vm608_vm6, %v610_v44, %v612_v56  ;;  %v603_v20 = vadd.f32 %v600_v58, %v432_v41 }
 0x10f   : > { %v514_v57 = vrot.slane %v508_v3, 1  ;;  %v524_v12 = vrot.slane %v508_v3, 2  ;;  %v493_v13 = vsel %vm363_vm3, %v490_v28, %v492_v2  ;;  %v947_v14 = vunpack.i.l.bf16 %v946_v4 }
 0x110   : > { %v499_v21 = vadd.f32 %v493_v13, %v487_v60  ;;  %v966_v10 = vadd.high.f32.bf16 %v581_v16, %v946_v4  ;;  %v624_v11 = vrot.slane %v603_v20, 6  ;;  %v500_v16 = vadd.f32 %v497_v62, %v364_v19 }
 0x111   : > { %v515_v61 = vsel %vm478_vm5, %v513_v59, %v514_v57  ;;  %v525_v8 = vsel %vm363_vm3, %v523_v9, %v524_v12  ;;  %v594_v29 = vrot.slane %v947_v14, 6  ;;  %v521_v15 = vadd.f32 %v514_v57, %v508_v3 }
 0x112   : > { %v520_v22 = vadd.f32 %v515_v61, %v506_v48  ;;  %v951_v26 = vpop.permute.xlu1 %950  ;;  %v599_v34 = vadd.f32 %v966_v10, %v591_v37  ;;  %v502_v44 = vadd.f32 %v499_v21, %v1435_v27  ;;  %v634_v27 = vmul.f32 8.0, %v1386_v6 }
 0x113   : > { %v952_v28 = vunpack.i.l.bf16 %v951_v26  ;;  %v595_v35 = vsel %vm387_vm2, %v592_v42, %v594_v29  ;;  %v967_v23 = vadd.high.f32.bf16 %v513_v59, %v951_v26 }
 0x114   : > { %v532_v33 = vadd.f32 %v525_v8, %v520_v22  ;;  %v601_v39 = vadd.f32 %v595_v35, %v589_v32  ;;  %v602_v41 = vadd.f32 %v599_v34, %v431_v18 }
 0x115   : > { %v526_v36 = vrot.slane %v952_v28, 2  ;;  %v531_v24 = vadd.f32 %v967_v23, %v523_v9 }
 0x116   : > { %v535_v25 = vadd.f32 %v532_v33, %v501_v55  ;;  %v604_v38 = vadd.f32 %v601_v39, %v433_v30  ;;  %v623_v37 = vrot.slane %v602_v41, 6 }
 0x117   : > { %v527_v43 = vsel %vm363_vm3, %v524_v12, %v526_v36  ;;  %v534_v40 = vadd.f32 %v531_v24, %v500_v16 }
 0x118   : > { %v618_v31 = vmin.f32 %v535_v25, %v611_v0  ;;  %v533_v46 = vadd.f32 %v527_v43, %v521_v15  ;;  %v625_v42 = vsel %vm387_vm2, %v623_v37, %v624_v11  ;;  %v626_v47 = vrot.slane %v604_v38, 6 }
 0x119   : > { %v617_v49 = vmin.f32 %v534_v40, %v609_v45 }
 0x11a   : > { %v536_v48 = vadd.f32 %v533_v46, %v502_v44  ;;  %v632_v51 = vmin.f32 %v618_v31, %v625_v42  ;;  %v627_v50 = vsel %vm387_vm2, %v624_v11, %v626_v47 }
 0x11b   : > { %v631_v19 = vmin.f32 %v617_v49, %v623_v37 }
 0x11c   : > { %v619_v52 = vmin.f32 %v536_v48, %v613_v63  ;;  %v640_v17 = vrot.slane %v632_v51, 7 }
 0x11d   : > { %v639_v56 = vrot.slane %v631_v19, 7 }
 0x11e   : > { %v633_v53 = vmin.f32 %v619_v52, %v627_v50 }
 0x11f   : > { %v641_v59 = vsel %vm608_vm6, %v639_v56, %v640_v17 }
 0x120   : > { %v642_v58 = vrot.slane %v633_v53, 7  ;;  %v646_v0 = vsub.f32 %v634_v27, %v641_v59 }
 0x122   : > { %v643_v60 = vsel %vm608_vm6, %v640_v17, %v642_v58  ;;  %v648_v45 = vmax.f32 %v646_v0, 0.0 }
 0x123   : > { %v647_v1 = vsub.f32 %v635_v54, %v643_v60 }
 0x124   : > { %v650_v3 = vsub.f32 0.0, %v648_v45 }
 0x125   : > { %v649_v2 = vmax.f32 %v647_v1, 0.0 }
 0x126   : > { %v652_v5 = vmul.f32 1.442695, %v650_v3 }
 0x127   : > { %v651_v4 = vsub.f32 0.0, %v649_v2 }
 0x128   : > { %954 = vpow2.f32 %v652_v5 }
 0x129   : > { %v654_v9 = vmul.f32 1.442695, %v651_v4 }
 0x12b   : > { %956 = vpow2.f32 %v654_v9 }
 0x132   : > { %v955_v6 = vpop.eup %954 }
 0x133   : > { %v656_v57 = vadd.f32 1.0, %v955_v6 }
 0x135   : > { %v957_v7 = vpop.eup %956  ;;  %958 = vrcp.f32 %v656_v57 }
 0x136   : > { %v657_v12 = vadd.f32 1.0, %v957_v7 }
 0x138   : > { %960 = vrcp.f32 %v657_v12 }
 0x13f   : > { %v959_v13 = vpop.eup %958 }
 0x140   : > { %660 = vst [vmem:[%s309_s19] sm:$0xff] %v959_v13 }
 0x142   : > { %v961_v14 = vpop.eup %960 }
 0x143   : > { %661 = vst [vmem:[%s309_s19 + $0x8] sm:$0xff] %v961_v14 }
 0x144   : > { %1071 = shalt.err (!%p1068_p13)
}
 0x145   : > { %s1072_s4 = scalar_lea.hbm %s1508_s5, 256  ;;  %s1076_s1 = scalar_lea.hbm %s1562_s3, 512 }
 0x146   : > { %p1073_p8 = scmp.ne.s32.totalorder %s1508_s5, %s1072_s4  ;;  %p1077_p5 = scmp.lt.u32.totalorder %s1508_s5, %s1562_s3 }
 0x147   : > { %p1078_p1 = scmp.lt.u32.totalorder %s1076_s1, %s1072_s4  ;;  %p1080_p2 = scmp.lt.u32.totalorder %s1072_s4, %s1508_s5 }
 0x148   : > { %p1074_p7 = pnand %p1073_p8, %p1587_p6 }
 0x149   : > { %p1079_p0 = por %p1078_p1, %p1077_p5 }
 0x14a   : > { %p1075_p3 = pneg %p1074_p7 }
 0x14b   : > { %p1081_p12 = por %p1080_p2, %p1079_p0 }
 0x14d   : > { %p1082_p4 = pnand %p1081_p12, %p1075_p3 }
 0x14f   : > { %1085 = shalt.err (!%p1082_p4)
}
 0x150   : > { %s1159_s18 = smov 128   ;;  %s1160_s24 = smov 8  }
 0x151   : > { %847 = dma.vmem_to_hbm [thread:$0]  (%p1587_p6), %s1510_s29, 256, %s1508_s5, %s663_s28, %s1159_s18, %s1159_s18, %s1160_s24  }
 0x152 PF: > { %s693_s23 = sand.u32 1, %s1124_s12   ;;  %p1588_p9 = scmp.ne.s32.totalorder %s1577_s27, 0 }
 0x153   : > { %p1589_p11 = scmp.ge.s32.totalorder %s1144_s17, 2  ;;  %s694_s8 = scalar_lea.sflag [#allocation5], %s693_s23 }
 0x155   : > { %p860_p10 = pnand %p1589_p11, %p1588_p9 }
 0x157   : > { %1119 = dma.done.wait (!%p860_p10), %s694_s8, 256  }
 0x158   : > { %1121 = vsyncadd (!%p860_p10), %s694_s8, 4294967040  ;;  %s22_s17 = sadd.s32 1, %s1144_s17   ;;  %s1590_s21 = sld [smem:[#allocation15_spill]] }
 0x159   : > { %p19_p13 = scmp.ge.s32.totalorder %s22_s17, 4   ;;  %s1591_s15 = sld [smem:[#allocation13_spill]] }
 0x15a   : > { %s1592_s16 = sld [smem:[#allocation14_spill]]  ;;  %s1593_s12 = smov %s1128_s13 }
 0x15b   : > { %s1594_s13 = smov %s1132_s14  ;;  %21 = sbr.rel (!%p19_p13) target bundleno = 11 (0xb), region = 101 }
 0x15e   : > { %s1595_s14 = smov %s1590_s21 }
 0x162   :  { %699 = vsyncpa [#allocation4], 1 }
 0x163   :  { %701 = vsyncpa [#allocation4 + $0x1], 1 }
 0x164   :  { %702 = vsyncpa [#allocation7], 1 }
 0x165   :  { %704 = vsyncpa [#allocation7 + $0x1], 1 }
 0x166   :  { %705 = vsyncpa [#allocation5], 1 }
 0x167   :  { %707 = vsyncpa [#allocation5 + $0x1], 1 }

</bundles_post_ra>
